<compile_context>
chip_gen: v7x
topology: tpu7x:2x2x1
jax: 0.10.0
libtpu: 0.0.40
codegen_flags: <defaults>
</compile_context>

<pallas_src>
import jax
import jax.numpy as jnp
from jax.experimental import pallas as pl
from jax.experimental.pallas import tpu as pltpu


def _round_up(a, b):
    return (a + b - 1) // b * b


def _make_focal_kernel(gamma, n_valid, tn, tiles_per_core, has_weight):
    gamma = float(gamma)

    def kernel(*refs):
        if has_weight:
            x_ref, tgt_ref, wt_ref, out_ref, acc_ref = refs
        else:
            x_ref, tgt_ref, out_ref, acc_ref = refs
            wt_ref = None

        c = pl.program_id(0)          # core-split axis ("parallel")
        i = pl.program_id(1)          # batch-tile axis ("arbitrary", accumulated)

        @pl.when(i == 0)
        def _():
            acc_ref[...] = jnp.zeros_like(acc_ref)

        # cast after the load: HBM traffic stays at the input's native dtype width
        z = x_ref[...].astype(jnp.float32)          # (TN, C)
        tgt = tgt_ref[...]                          # (TN, 1) int32

        # single reusable target mask (iota compare); no f32 one-hot materialized
        col = jax.lax.broadcasted_iota(jnp.int32, z.shape, 1)
        is_target = col == tgt                      # (TN, C) bool

        # cross entropy, reduction='none':  ce_i = logsumexp(z_i) - z_i[target_i]
        zmax = jnp.max(z, axis=1, keepdims=True)
        lse = zmax + jnp.log(jnp.sum(jnp.exp(z - zmax), axis=1, keepdims=True))
        z_t = jnp.sum(jnp.where(is_target, z, 0.0), axis=1, keepdims=True)
        ce = lse - z_t                              # (TN, 1)

        if has_weight:
            # per-row weight was pre-gathered in the wrapper: (TN, 1) f32
            ce = wt_ref[...].astype(jnp.float32) * ce

        # focal modulation: (1 - exp(-ce))**gamma * ce   (gamma == 0 -> plain CE)
        if gamma == 0.0:
            focal = ce
        else:
            p = jnp.exp(-ce)
            base = jnp.maximum(1.0 - p, 0.0)        # clamp: no NaN from pow(neg, frac)
            focal = (base ** gamma) * ce

        # mask rows past the end of the batch (ragged last tile / duplicate clamped
        # tile on the other core).  NaN/garbage stays confined to masked rows because
        # every reduction above is per-row.
        t = c * tiles_per_core + i                  # global (unclamped) tile index
        row = jax.lax.broadcasted_iota(jnp.int32, (tn, 1), 0)
        valid = (t * tn + row) < n_valid
        acc_ref[...] = acc_ref[...] + jnp.sum(jnp.where(valid, focal, 0.0))

        @pl.when(i == pl.num_programs(1) - 1)
        def _():
            out_ref[...] = acc_ref[...].reshape(out_ref.shape)

    return kernel


def focal_loss(x, target, weight=None, gamma=0.0):
    """Pallas TPU FocalLoss forward.

    x: (N, C) logits (any float dtype); target: (N,) int class indices;
    weight: optional (C,) per-class CE weights; gamma: focusing parameter >= 0.
    Returns a scalar f32 loss = mean_i (1 - exp(-ce_i))**gamma * ce_i.
    """
    assert gamma >= 0
    N, C = x.shape
    itemsize = x.dtype.itemsize

    # VMEM budget per batch-row: double-buffered native-dtype input tile plus ~3
    # (TN, C) f32 intermediates (cast z, exp(z-zmax), select temp).  12 MiB total
    # keeps us inside v5e's 16 MiB default scoped VMEM and v7x's 64 MiB physical.
    per_row_bytes = C * (2 * itemsize + 3 * 4)
    budget = 12 * 1024 * 1024
    tn = (budget // max(per_row_bytes, 1)) // 8 * 8
    tn = max(8, min(tn, 1024, _round_up(N, 8)))     # >=85% HBM roofline by ~512-1024 rows

    n_tiles = pl.cdiv(N, tn)
    tiles_per_core = pl.cdiv(n_tiles, 2)            # leading "parallel" axis -> 2 TCs on v7x
    grid = (2, tiles_per_core)

    tgt = target.astype(jnp.int32).reshape(N, 1)

    def row_map(c, i):
        # clamp so the last (possibly empty) per-core tile never DMAs out of bounds;
        # the in-kernel validity mask zeroes its contribution.
        return (jnp.minimum(c * tiles_per_core + i, n_tiles - 1), 0)

    has_weight = weight is not None
    args = [x, tgt]
    in_specs = [
        pl.BlockSpec((tn, C), row_map),             # full class extent: no class pad
        pl.BlockSpec((tn, 1), row_map),
    ]
    if has_weight:
        # gather per-row weight on the XLA side (O(N), negligible) instead of a
        # (TN, C) masked reduction inside the kernel.
        w_row = weight.astype(jnp.float32)[target].reshape(N, 1)
        args.append(w_row)
        in_specs.append(pl.BlockSpec((tn, 1), row_map))

    kernel = _make_focal_kernel(gamma, N, tn, tiles_per_core, has_weight)

    cost = pl.CostEstimate(
        flops=8 * N * C,
        transcendentals=N * C + 4 * N,
        bytes_accessed=N * C * itemsize + N * 4 * (2 if has_weight else 1) + 8,
    )

    partial = pl.pallas_call(
        kernel,
        out_shape=jax.ShapeDtypeStruct((2, 1, 1), jnp.float32),   # per-core partial sums
        grid=grid,
        in_specs=in_specs,
        out_specs=pl.BlockSpec((1, 1, 1), lambda c, i: (c, 0, 0)),
        scratch_shapes=[pltpu.VMEM((1, 1), jnp.float32)],
        compiler_params=pltpu.CompilerParams(
            dimension_semantics=("parallel", "arbitrary")),
        cost_estimate=cost,
    )(*args)

    # mean over per-sample losses (matches reduction='none' followed by .mean()).
    return jnp.sum(partial) / jnp.float32(N)


def _reference(x, target, weight=None, gamma=0.0):
    # pure-JAX reference of the PyTorch FocalLoss forward
    x = x.astype(jnp.float32)
    logp = jax.nn.log_softmax(x, axis=1)
    ce = -jnp.take_along_axis(logp, target[:, None].astype(jnp.int32), axis=1)[:, 0]
    if weight is not None:
        ce = ce * weight.astype(jnp.float32)[target]
    p = jnp.exp(-ce)
    return jnp.mean((1.0 - p) ** gamma * ce)


if __name__ == "__main__":
    key = jax.random.PRNGKey(0)

    def run_case(N, C, use_weight, gamma):
        kx, kt, kw = jax.random.split(jax.random.fold_in(key, N * 1000 + C), 3)
        x = jax.random.normal(kx, (N, C), dtype=jnp.float32)
        target = jax.random.randint(kt, (N,), 0, C, dtype=jnp.int32)
        w = (jax.random.uniform(kw, (C,), jnp.float32, 0.5, 1.5) if use_weight else None)
        got = jax.block_until_ready(focal_loss(x, target, weight=w, gamma=gamma))
        ref = _reference(x, target, weight=w, gamma=gamma)
        assert jnp.allclose(got, ref, rtol=1e-4, atol=1e-4), (
            (N, C, use_weight, gamma), got, ref)

    # aligned shapes and ragged shapes (N not a multiple of 8, C not a multiple of 128)
    for (N, C) in [(8, 16), (13, 10)]:
        for use_weight, gamma in [(False, 0.0), (False, 2.0), (True, 1.0)]:
            run_case(N, C, use_weight, gamma)

    print("KERNEL_OK")
</pallas_src>

<mosaic_0001>
module attributes {stable_mosaic.version = 11 : i64} {
  func.func @kernel(%arg0: i32, %arg1: i32, %arg2: memref<8x16xf32, #tpu.memory_space<vmem>>, %arg3: memref<8x1xi32, #tpu.memory_space<vmem>>, %arg4: memref<1x1x1xf32, #tpu.memory_space<vmem>>, %arg5: memref<1x1xf32, #tpu.memory_space<vmem>>) attributes {dimension_semantics = [#tpu.dimension_semantics<parallel>, #tpu.dimension_semantics<arbitrary>], iteration_bounds = array<i64: 2, 1>, scalar_prefetch = 0 : i64, scratch_operands = 1 : i64, tpu.core_type = #tpu.core_type<tc>, window_params = [{transform_indices = @transform_0, window_bounds = array<i64: 8, 16>}, {transform_indices = @transform_1, window_bounds = array<i64: 8, 1>}, {transform_indices = @transform_2, window_bounds = array<i64: 1, 1, 1>}]} {
    %c0_i32 = arith.constant 0 : i32
    %0 = arith.cmpi eq, %arg1, %c0_i32 : i32
    %1 = arith.extui %0 : i1 to i32
    %c0_i32_0 = arith.constant 0 : i32
    %2 = arith.cmpi ne, %1, %c0_i32_0 : i32
    scf.if %2 {
      %cst_16 = arith.constant 0.000000e+00 : f32
      %43 = vector.broadcast %cst_16 : f32 to vector<1x1xf32>
      %c0_17 = arith.constant 0 : index
      %c0_18 = arith.constant 0 : index
      %44 = vector.load %arg5[%c0_17, %c0_18] : memref<1x1xf32, #tpu.memory_space<vmem>>, vector<1x1xf32>
      tpu.vector_store %arg5[%c0_17, %c0_18], %43 {strides = array<i32>} : memref<1x1xf32, #tpu.memory_space<vmem>>, vector<1x1xf32>,
    } else {
    }
    %c0 = arith.constant 0 : index
    %c0_1 = arith.constant 0 : index
    %3 = vector.load %arg2[%c0, %c0_1] : memref<8x16xf32, #tpu.memory_space<vmem>>, vector<8x16xf32>
    %c0_2 = arith.constant 0 : index
    %c0_3 = arith.constant 0 : index
    %4 = vector.load %arg3[%c0_2, %c0_3] : memref<8x1xi32, #tpu.memory_space<vmem>>, vector<8x1xi32>
    %5 = tpu.iota {dimensions = array<i32: 1>} : vector<8x16xi32>
    %6 = vector.broadcast %4 : vector<8x1xi32> to vector<8x16xi32>
    %7 = arith.cmpi eq, %5, %6 : vector<8x16xi32>
    %cst = arith.constant dense<0xFF800000> : vector<8xf32>
    %8 = vector.multi_reduction <maximumf>, %3, %cst [1] : vector<8x16xf32> to vector<8xf32>
    %9 = vector.shape_cast %8 : vector<8xf32> to vector<8x1xf32>
    %10 = vector.broadcast %9 : vector<8x1xf32> to vector<8x16xf32>
    %11 = arith.subf %3, %10 : vector<8x16xf32>
    %12 = math.exp %11 : vector<8x16xf32>
    %cst_4 = arith.constant dense<0.000000e+00> : vector<8xf32>
    %13 = vector.multi_reduction <add>, %12, %cst_4 [1] : vector<8x16xf32> to vector<8xf32>
    %14 = vector.shape_cast %13 : vector<8xf32> to vector<8x1xf32>
    %15 = math.log %14 : vector<8x1xf32>
    %16 = arith.addf %9, %15 : vector<8x1xf32>
    %cst_5 = arith.constant 0.000000e+00 : f32
    %17 = vector.broadcast %cst_5 : f32 to vector<8x16xf32>
    %18 = arith.select %7, %3, %17 : vector<8x16xi1>, vector<8x16xf32>
    %cst_6 = arith.constant dense<0.000000e+00> : vector<8xf32>
    %19 = vector.multi_reduction <add>, %18, %cst_6 [1] : vector<8x16xf32> to vector<8xf32>
    %20 = vector.shape_cast %19 : vector<8xf32> to vector<8x1xf32>
    %21 = arith.subf %16, %20 : vector<8x1xf32>
    %c1_i32 = arith.constant 1 : i32
    %22 = arith.muli %arg0, %c1_i32 : i32
    %23 = arith.addi %22, %arg1 : i32
    %24 = tpu.iota {dimensions = array<i32: 0>} : vector<8x1xi32>
    %c8_i32 = arith.constant 8 : i32
    %25 = arith.muli %23, %c8_i32 : i32
    %26 = vector.broadcast %25 : i32 to vector<8x1xi32>
    %27 = arith.addi %26, %24 : vector<8x1xi32>
    %c8_i32_7 = arith.constant 8 : i32
    %28 = vector.broadcast %c8_i32_7 : i32 to vector<8x1xi32>
    %29 = arith.cmpi slt, %27, %28 : vector<8x1xi32>
    %c0_8 = arith.constant 0 : index
    %c0_9 = arith.constant 0 : index
    %30 = vector.load %arg5[%c0_8, %c0_9] : memref<1x1xf32, #tpu.memory_space<vmem>>, vector<1x1xf32>
    %cst_10 = arith.constant 0.000000e+00 : f32
    %31 = vector.broadcast %cst_10 : f32 to vector<8x1xf32>
    %32 = arith.select %29, %21, %31 : vector<8x1xi1>, vector<8x1xf32>
    %33 = vector.shape_cast %32 : vector<8x1xf32> to vector<1x8x1xf32>
    %cst_11 = arith.constant dense<0.000000e+00> : vector<1xf32>
    %34 = vector.multi_reduction <add>, %33, %cst_11 [1, 2] : vector<1x8x1xf32> to vector<1xf32>
    %35 = vector.shape_cast %34 : vector<1xf32> to vector<1x1x1xf32>
    %36 = vector.extract %35[0, 0, 0] : f32 from vector<1x1x1xf32>
    %37 = vector.broadcast %36 : f32 to vector<1x1xf32>
    %38 = arith.addf %30, %37 : vector<1x1xf32>
    %c0_12 = arith.constant 0 : index
    %c0_13 = arith.constant 0 : index
    %39 = vector.load %arg5[%c0_12, %c0_13] : memref<1x1xf32, #tpu.memory_space<vmem>>, vector<1x1xf32>
    tpu.vector_store %arg5[%c0_12, %c0_13], %38 {strides = array<i32>} : memref<1x1xf32, #tpu.memory_space<vmem>>, vector<1x1xf32>,
    %c0_i32_14 = arith.constant 0 : i32
    %40 = arith.cmpi eq, %arg1, %c0_i32_14 : i32
    %41 = arith.extui %40 : i1 to i32
    %c0_i32_15 = arith.constant 0 : i32
    %42 = arith.cmpi ne, %41, %c0_i32_15 : i32
    scf.if %42 {
      %c0_16 = arith.constant 0 : index
      %c0_17 = arith.constant 0 : index
      %43 = vector.load %arg5[%c0_16, %c0_17] : memref<1x1xf32, #tpu.memory_space<vmem>>, vector<1x1xf32>
      %44 = vector.shape_cast %43 : vector<1x1xf32> to vector<1x1x1xf32>
      %c0_18 = arith.constant 0 : index
      %c0_19 = arith.constant 0 : index
      %c0_20 = arith.constant 0 : index
      %45 = vector.load %arg4[%c0_18, %c0_19, %c0_20] : memref<1x1x1xf32, #tpu.memory_space<vmem>>, vector<1x1x1xf32>
      tpu.vector_store %arg4[%c0_18, %c0_19, %c0_20], %44 {strides = array<i32>} : memref<1x1x1xf32, #tpu.memory_space<vmem>>, vector<1x1x1xf32>,
    } else {
    }
    return
  }
  func.func @transform_0(%arg0: i32, %arg1: i32) -> (i32, i32) {
    %c1_i32 = arith.constant 1 : i32
    %0 = arith.muli %arg0, %c1_i32 : i32
    %1 = arith.addi %0, %arg1 : i32
    %c0_i32 = arith.constant 0 : i32
    %2 = arith.minsi %1, %c0_i32 : i32
    %c0_i32_0 = arith.constant 0 : i32
    %c0_i32_1 = arith.constant 0 : i32
    return %2, %c0_i32_0 : i32, i32
  }
  func.func @transform_1(%arg0: i32, %arg1: i32) -> (i32, i32) {
    %c1_i32 = arith.constant 1 : i32
    %0 = arith.muli %arg0, %c1_i32 : i32
    %1 = arith.addi %0, %arg1 : i32
    %c0_i32 = arith.constant 0 : i32
    %2 = arith.minsi %1, %c0_i32 : i32
    %c0_i32_0 = arith.constant 0 : i32
    %c0_i32_1 = arith.constant 0 : i32
    return %2, %c0_i32_0 : i32, i32
  }
  func.func @transform_2(%arg0: i32, %arg1: i32) -> (i32, i32, i32) {
    %c0_i32 = arith.constant 0 : i32
    %c0_i32_0 = arith.constant 0 : i32
    %c0_i32_1 = arith.constant 0 : i32
    return %arg0, %c0_i32, %c0_i32_0 : i32, i32, i32
  }
}

</mosaic_0001>

<bundles_post_ra>
// kernel: tpu_custom_call.1
= control target key start
LH: loop header
LB: loop body
LE: loop exit
PB: predicated region body
PF: predicated region fallthrough
CT: control target
= control target key end

     0   :  { %s426_s9 = smov 0   ;;  %s428_s10 = smov 0   ;;  %s475_s0 = inlined_call_operand.vmem [shape: f32[8,16], index: 0, kind: input, shape index: {}]   ;;  %s476_s1 = inlined_call_operand.vmem [shape: s32[8,1], index: 1, kind: input, shape index: {}]   ;;  %s477_s2 = inlined_call_operand.vmem [shape: f32[2,1,1], index: 2, kind: output, shape index: {}]  }
   0x1   :  { %s430_s11 = smov 0  }
   0x2 LB: > { %s24_s12 = sadd.s32 1, %s403_s10  ;;  %p340_p0 = scmp.ge.s32.totalorder %s407_s11, 1  ;;  %s407_s11 = sphi %s430_s11, %s12_s11   ;;  %s403_s10 = sphi %s428_s10, %s479_s10   ;;  %s399_s9 = sphi %s426_s9, %s478_s9  }
   0x3   : > { %p26_p1 = scmp.ge.s32.totalorder %s24_s12, 2  ;;  %p156_p2 = scmp.lt.s32.totalorder %s407_s11, 3 }
   0x5   : > { %s481_s12 = smov (%p26_p1, %s24_s12), 0  ;;  %p157_p3 = pnand %p340_p0, %p156_p2 }
   0x6   : > { %p186_p4 = scmp.lt.s32.totalorder (!%p157_p3), %s399_s9, 0  ;;  %v409_v0 = vmov (!%p157_p3), 0   ;;  %vm222_vm0 = vcmask (!%p157_p3), 130048   ;;  %v216_v7 = vlaneseq (!%p157_p3)  ;;  %s349_s21 = sshll.u32 (!%p157_p3), %s399_s9, 3  ;;  %vm249_vm3 = vcmask (!%p157_p3), 7168  }
   0x7   : > { %160 = sbr.rel (%p157_p3) target bundleno = 556 (0x22c), region = 28  ;;  %380 = vset.pattern.permute.xlu0 (!%p157_p3), %v409_v0  ;;  %v244_v16 = vstv (!%p157_p3), %s349_s21  ;;  %vm212_vm4 = vcmask (!%p157_p3), 0   ;;  %v410_v25 = vmov (!%p157_p3), 0.0   ;;  %p205_p5 = scmp.lt.s32.totalorder (!%p157_p3), %s399_s9, 1 }
   0x8   : > { %v217_v8 = vand.u32 (!%p157_p3), 127, %v216_v7  ;;  %v242_v15 = vshrl.u32 (!%p157_p3), %v216_v7, 7  ;;  %213 = vst.msk [vmem:[#allocation2] sm:$0x1] (!%p157_p3), %vm212_vm4, %v410_v25 }
   0xa   : > { %v245_v18 = vadd.s32 (!%p157_p3), %v244_v16, %v242_v15 }
   0xc   : > { %vm246_vm2 = vcmp.lt.s32.totalorder (!%p157_p3), %v245_v18, 8 }
   0xe   : > { %s187_s13 = scalar_select %p186_p4, %s399_s9, 0 }
   0xf   : > { %v247_v33 = vld [vmem:[#allocation2] sm:$0x1]  ;;  %s485_s9 = smov (!%p205_p5, %s399_s9), 1 }
  0x10   : > { %s483_s13 = smov (!%p186_p4, %s187_s13), 0  ;;  %s207_s25 = scalar_lea.vmem %s477_s2, %s485_s9 }
  0x11   : > { %s344_s14 = sshll.u32 %s483_s13, 3 }
  0x12   : > { %s191_s17 = scalar_lea.vmem %s475_s0, %s344_s14  ;;  %s201_s20 = scalar_lea.vmem %s476_s1, %s344_s14 }
  0x13   : > { %v214_v1 = vld [vmem:[%s191_s17] sm:$0xff] }
  0x14   : > { %v223_v2 = vsel %vm222_vm0, %v214_v1, -inf  ;;  %v215_v3 = vld [vmem:[%s201_s20] sm:$0xff] }
  0x15   : > { %224 = vmax.xlane.f32.xlu0 %v223_v2 }
  0x2b   : > { %219 = vperm.xlu0 %380, %v215_v3  }
  0xa2   : > { %v225_v4 = vpop.xlane.xlu0 %224 }
  0xa3   : > { %v226_v5 = vsub.f32 %v214_v1, %v225_v4 }
  0xa5   : > { %v227_v6 = vmul.f32 1.442695, %v226_v5 }
  0xa7   : > { %381 = vpow2.f32 %v227_v6 }
  0xaa   : > { %v220_v9 = vpop.permute.xlu0 %219 }
  0xab   : > { %vm221_vm1 = vcmp.eq.s32.totalorder %v217_v8, %v220_v9 }
  0xac   : > { %v235_v11 = vsel %vm221_vm1, %v214_v1, 0.0 }
  0xad   : > { %v236_v13 = vsel %vm222_vm0, %v235_v11, 0.0 }
  0xb1   : > { %v382_v10 = vpop.eup %381 }
  0xb2   : > { %v229_v12 = vsel %vm222_vm0, %v382_v10, 0.0 }
  0xb3   : > { %230 = vadd.xlane.f32.xlu1 %v229_v12 }
  0xb7   : > { %237 = vadd.xlane.f32.xlu1 %v236_v13 }
 0x140   : > { %v231_v14 = vpop.xlane.xlu1 %230 }
 0x141   : > { %383 = vlog2.f32 %v231_v14 }
 0x144   : > { %v238_v20 = vpop.xlane.xlu1 %237 }
 0x14b   : > { %v384_v17 = vpop.eup %383 }
 0x14c   : > { %v233_v19 = vmul.f32 0.6931472, %v384_v17 }
 0x14e   : > { %v234_v21 = vadd.f32 %v233_v19, %v225_v4 }
 0x150   : > { %v239_v22 = vsub.f32 %v234_v21, %v238_v20 }
 0x152   : > { %v248_v23 = vsel %vm246_vm2, %v239_v22, 0.0 }
 0x153   : > { %v250_v24 = vsel %vm249_vm3, %v248_v23, 0.0 }
 0x154   : > { %251 = vadd.xlane.f32.xlu1 %v250_v24 }
 0x1e1   : > { %v252_v26 = vpop.xlane.xlu1 %251 }
 0x1e2   : > { %v253_v27 = vrot.slane %v252_v26, 4 }
 0x1e4   : > { %v254_v28 = vadd.f32 %v253_v27, %v252_v26 }
 0x1e6   : > { %v255_v29 = vrot.slane %v254_v28, 2 }
 0x1e8   : > { %v256_v30 = vadd.f32 %v255_v29, %v254_v28 }
 0x1ea   : > { %v257_v31 = vrot.slane %v256_v30, 1 }
 0x1ec   : > { %v258_v32 = vadd.f32 %v257_v31, %v256_v30 }
 0x1ee   : > { %352 = vpush %v258_v32 }
 0x21f   : > { %s353_s22 = spop %352 }
 0x220   : > { %v260_v34 = vstv %s353_s22 }
 0x221   : > { %v261_v35 = vadd.f32 %v260_v34, %v247_v33 }
 0x223   : > { %263 = vst.msk [vmem:[#allocation2] sm:$0x1] %vm212_vm4, %v261_v35 }
 0x22a   : > { %v267_v36 = vld [vmem:[#allocation2] sm:$0x1] }
 0x22b   : > { %268 = vst.msk [vmem:[%s207_s25] sm:$0x1] %vm212_vm4, %v267_v36 }
 0x22c PF: > { %s12_s11 = sadd.s32 1, %s407_s11   ;;  %s478_s9 = smov %s403_s10 }
 0x22d   : > { %p9_p6 = scmp.ge.s32.totalorder %s12_s11, 4   ;;  %s479_s10 = smov %s481_s12 }
 0x22f   :  { %11 = sbr.rel (!%p9_p6) target bundleno = 2 (0x2), region = 69 }

</bundles_post_ra>
